<compile_context>
chip_gen: v7x
topology: tpu7x:2x2x1
jax: 0.10.0
libtpu: 0.0.40
codegen_flags: <defaults>
</compile_context>

<pallas_src>
import numpy as np
import jax
import jax.numpy as jnp
from jax.experimental import pallas as pl
from jax.experimental.pallas import tpu as pltpu


# ----------------------------------------------------------------------------
# Constant separable bilinear-x2 matrix (PyTorch align_corners=False semantics)
# ----------------------------------------------------------------------------
def _bilinear_up2_matrix(length):
    """(2L, L) matrix U such that (U @ v) is the x2 bilinear upsample of v.

    Matches torch.nn.Upsample(scale_factor=2, mode='bilinear', align_corners=False):
      out[2i]   = 0.75*v[i] + 0.25*v[max(i-1, 0)]
      out[2i+1] = 0.75*v[i] + 0.25*v[min(i+1, L-1)]
    """
    u = np.zeros((2 * length, length), np.float32)
    for a in range(2 * length):
        i = a // 2
        nb = i - 1 if a % 2 == 0 else i + 1
        nb = min(max(nb, 0), length - 1)
        u[a, i] += 0.75
        u[a, nb] += 0.25
    return u


# ----------------------------------------------------------------------------
# Pallas kernel: fused (1x1 conv  ->  bilinear x2) on one (batch, column-tile)
# ----------------------------------------------------------------------------
def _upsample_conv_kernel(x_ref, w_ref, m_ref, o_ref):
    # x_ref: (1, C, H*W)   image, channels on sublanes, flat spatial on lanes
    # w_ref: (C, C)        1x1 conv weight, rows = c_out, cols = c_in
    # m_ref: (H*W, T)      column tile of the bilinear-x2 scatter matrix
    # o_ref: (1, C, T)     column tile of the flat (N, C, 2H*2W) output
    # Two f32 MXU matmuls; no VPU stencils, rolls, stacks or masked stores needed.
    y = jnp.dot(w_ref[...], x_ref[0], preferred_element_type=jnp.float32)      # 1x1 conv (channel mix)
    o_ref[0] = jnp.dot(y, m_ref[...],                                          # bilinear x2 upsample
                       preferred_element_type=jnp.float32).astype(o_ref.dtype)


# ----------------------------------------------------------------------------
# Public wrapper (PyTorch NCHW in / NCHW out, no transposes)
# ----------------------------------------------------------------------------
def scale_upsample(x_nchw, w):
    """Fused bilinear x2 upsample + 1x1 conv (bias=False), PyTorch NCHW semantics.

    x_nchw: (N, C, H, W);  w: (C, C) == torch_weight[:, :, 0, 0]  (rows c_out, cols c_in).
    Returns (N, C, 2H, 2W) in x_nchw.dtype.
    """
    N, C, H, W = x_nchw.shape
    assert w.shape == (C, C)
    HW, OHW = H * W, 4 * H * W

    # Trace-time numpy constant:  M[h*W + w, a*2W + b] = U_H[a, h] * U_W[b, w],
    # so  out_flat(C, 4HW) = y(C, HW) @ M.
    m = jnp.asarray(np.kron(_bilinear_up2_matrix(H), _bilinear_up2_matrix(W)).T)

    # Lane-dense column tiling of the flattened output spatial dim: multiples of 128
    # lanes and >=2 tiles so both v7x TensorCores have work even when N == 1.
    t_out = OHW
    if OHW % 256 == 0:
        t_out = OHW // 2
        while t_out > 4096 and t_out % 256 == 0:
            t_out //= 2
    n_col = OHW // t_out

    x_flat = x_nchw.reshape(N, C, HW)          # free reshape (contiguous NCHW view)

    out_flat = pl.pallas_call(
        _upsample_conv_kernel,
        out_shape=jax.ShapeDtypeStruct((N, C, OHW), x_nchw.dtype),
        grid=(n_col, N),                       # column axis outermost: M block stays resident over N
        in_specs=[
            pl.BlockSpec((1, C, HW), lambda j, n: (n, 0, 0)),
            pl.BlockSpec((C, C), lambda j, n: (0, 0)),
            pl.BlockSpec((HW, t_out), lambda j, n: (0, j)),
        ],
        out_specs=pl.BlockSpec((1, C, t_out), lambda j, n: (n, 0, j)),
        compiler_params=pltpu.CompilerParams(
            dimension_semantics=("parallel", "parallel")),
    )(x_flat, w, m)

    return out_flat.reshape(N, C, 2 * H, 2 * W)   # free reshape back to NCHW


# ----------------------------------------------------------------------------
# Pure-JAX reference (PyTorch semantics: upsample first, then 1x1 conv, all f32)
# ----------------------------------------------------------------------------
def _ref_scale_upsample(x_nchw, w):
    x = x_nchw.astype(jnp.float32)
    _, _, H, W = x.shape

    def taps(L):
        o = jnp.arange(2 * L, dtype=jnp.float32)
        src = jnp.maximum(o * 0.5 - 0.25, 0.0)     # align_corners=False, low clamp
        lo = jnp.floor(src).astype(jnp.int32)
        hi = jnp.minimum(lo + 1, L - 1)
        frac = src - lo.astype(jnp.float32)
        return lo, hi, frac

    lo_h, hi_h, fh = taps(H)
    lo_w, hi_w, fw = taps(W)
    xh = (x[:, :, lo_h, :] * (1.0 - fh)[None, None, :, None]
          + x[:, :, hi_h, :] * fh[None, None, :, None])
    up = (xh[:, :, :, lo_w] * (1.0 - fw)[None, None, None, :]
          + xh[:, :, :, hi_w] * fw[None, None, None, :])
    return jnp.einsum('oc,nchw->nohw', w, up)      # Conv2d 1x1, bias=False


# ----------------------------------------------------------------------------
if __name__ == "__main__":
    N, C, H, W = 2, 16, 16, 16

    key = jax.random.PRNGKey(0)
    kx, kw = jax.random.split(key)
    x = jax.random.normal(kx, (N, C, H, W), jnp.float32)        # NCHW, like PyTorch
    w = 0.05 * jax.random.normal(kw, (C, C), jnp.float32)       # (C_out, C_in)

    fwd = jax.jit(scale_upsample)
    out = fwd(x, w)
    jax.block_until_ready(out)

    ref = _ref_scale_upsample(x, w)
    assert out.shape == (N, C, 2 * H, 2 * W), out.shape
    assert ref.shape == out.shape
    # All-f32 path (only fp summation order differs from PyTorch); observed max |err|
    # is ~1e-6 — the bound below is kept loose purely for robustness.
    max_err = float(jnp.max(jnp.abs(out - ref)))
    assert jnp.allclose(out, ref, rtol=1e-2, atol=1e-2), max_err

    print("KERNEL_OK")
</pallas_src>

<mosaic_0001>
module attributes {stable_mosaic.version = 11 : i64} {
  func.func @_upsample_conv_kernel(%arg0: i32, %arg1: i32, %arg2: memref<1x16x256xf32, #tpu.memory_space<vmem>>, %arg3: memref<16x16xf32, #tpu.memory_space<vmem>>, %arg4: memref<256x512xf32, #tpu.memory_space<vmem>>, %arg5: memref<1x16x512xf32, #tpu.memory_space<vmem>>) attributes {dimension_semantics = [#tpu.dimension_semantics<parallel>, #tpu.dimension_semantics<parallel>], iteration_bounds = array<i64: 2, 2>, scalar_prefetch = 0 : i64, scratch_operands = 0 : i64, tpu.core_type = #tpu.core_type<tc>, window_params = [{transform_indices = @transform_0, window_bounds = array<i64: 1, 16, 256>}, {pipeline_mode = #tpu.pipeline_mode<synchronous>, transform_indices = @transform_1, window_bounds = array<i64: 16, 16>}, {transform_indices = @transform_2, window_bounds = array<i64: 256, 512>}, {transform_indices = @transform_3, window_bounds = array<i64: 1, 16, 512>}]} {
    %c0 = arith.constant 0 : index
    %c0_0 = arith.constant 0 : index
    %0 = vector.load %arg3[%c0, %c0_0] : memref<16x16xf32, #tpu.memory_space<vmem>>, vector<16x16xf32>
    %c0_1 = arith.constant 0 : index
    %c0_2 = arith.constant 0 : index
    %c0_3 = arith.constant 0 : index
    %1 = vector.load %arg2[%c0_1, %c0_2, %c0_3] : memref<1x16x256xf32, #tpu.memory_space<vmem>>, vector<1x16x256xf32>
    %2 = vector.shape_cast %1 : vector<1x16x256xf32> to vector<16x256xf32>
    %cst = arith.constant dense<0.000000e+00> : vector<16x256xf32>
    %3 = tpu.matmul %0, %2, %cst {dimension_numbers = #tpu.dot_dimension_numbers<[1], [0], [0], [1], [0, 0, 1, 1], [], []>} : vector<16x16xf32>, vector<16x256xf32>, vector<16x256xf32> -> vector<16x256xf32>
    %c0_4 = arith.constant 0 : index
    %c0_5 = arith.constant 0 : index
    %4 = vector.load %arg4[%c0_4, %c0_5] : memref<256x512xf32, #tpu.memory_space<vmem>>, vector<256x512xf32>
    %cst_6 = arith.constant dense<0.000000e+00> : vector<16x512xf32>
    %5 = tpu.matmul %3, %4, %cst_6 {dimension_numbers = #tpu.dot_dimension_numbers<[1], [0], [0], [1], [0, 0, 1, 1], [], []>} : vector<16x256xf32>, vector<256x512xf32>, vector<16x512xf32> -> vector<16x512xf32>
    %c0_7 = arith.constant 0 : index
    %c0_8 = arith.constant 0 : index
    %c0_9 = arith.constant 0 : index
    %6 = vector.load %arg5[%c0_7, %c0_8, %c0_9] : memref<1x16x512xf32, #tpu.memory_space<vmem>>, vector<1x16x512xf32>
    %7 = vector.shape_cast %6 : vector<1x16x512xf32> to vector<16x512xf32>
    %8 = vector.shape_cast %5 : vector<16x512xf32> to vector<1x16x512xf32>
    tpu.vector_store %arg5[%c0_7, %c0_8, %c0_9], %8 {strides = array<i32>} : memref<1x16x512xf32, #tpu.memory_space<vmem>>, vector<1x16x512xf32>,
    return
  }
  func.func @transform_0(%arg0: i32, %arg1: i32) -> (i32, i32, i32) {
    %c0_i32 = arith.constant 0 : i32
    %c0_i32_0 = arith.constant 0 : i32
    %c0_i32_1 = arith.constant 0 : i32
    return %arg1, %c0_i32, %c0_i32_0 : i32, i32, i32
  }
  func.func @transform_1(%arg0: i32, %arg1: i32) -> (i32, i32) {
    %c0_i32 = arith.constant 0 : i32
    %c0_i32_0 = arith.constant 0 : i32
    %c0_i32_1 = arith.constant 0 : i32
    return %c0_i32, %c0_i32_0 : i32, i32
  }
  func.func @transform_2(%arg0: i32, %arg1: i32) -> (i32, i32) {
    %c0_i32 = arith.constant 0 : i32
    %c0_i32_0 = arith.constant 0 : i32
    return %c0_i32, %arg0 : i32, i32
  }
  func.func @transform_3(%arg0: i32, %arg1: i32) -> (i32, i32, i32) {
    %c0_i32 = arith.constant 0 : i32
    %c0_i32_0 = arith.constant 0 : i32
    return %arg1, %c0_i32, %arg0 : i32, i32, i32
  }
}

</mosaic_0001>

<bundles_post_ra>
// kernel: scale_upsample.1
= control target key start
LH: loop header
LB: loop body
LE: loop exit
PB: predicated region body
PF: predicated region fallthrough
CT: control target
= control target key end

     0   :  { %8 = vsyncpa [#allocation3], 0  ;;  %s1434_s0 = inlined_call_operand.vmem [shape: f32[2,16,256], index: 0, kind: input, shape index: {}]   ;;  %s1435_s1 = inlined_call_operand.vmem [shape: f32[16,16], index: 1, kind: input, shape index: {}]   ;;  %s1436_s2 = inlined_call_operand.hbm [shape: f32[256,1024], index: 2, kind: input, shape index: {}]   ;;  %s1437_s3 = inlined_call_operand.vmem [shape: f32[2,16,1024], index: 3, kind: output, shape index: {}]  }
   0x1   :  { %10 = vsyncpa [#allocation3 + $0x1], 0  ;;  %s1116_s12 = smov 0   ;;  %s1118_s13 = smov 0  }
   0x2   :  { %s1120_s14 = smov 0   ;;  %s1122_s15 = smov 0  }
   0x3   :  { %s1124_s16 = smov 0   ;;  %s1126_s17 = smov 0  }
   0x4   :  { %s1128_s18 = smov 0   ;;  %s1130_s19 = smov 0  }
   0x5   :  { %s1132_s20 = smov 0   ;;  %s1134_s21 = smov 0  }
   0x6 LB: > { %s732_s22 = sadd.s32 4294967295, %s1089_s21   ;;  %s25_s23 = sadd.s32 1, %s1081_s19  ;;  %s1089_s21 = sphi %s1134_s21, %s16_s21   ;;  %s1085_s20 = sphi %s1132_s20, %s1454_s20   ;;  %s1081_s19 = sphi %s1130_s19, %s1453_s19   ;;  %s1077_s18 = sphi %s1128_s18, %s1452_s18   ;;  %s1073_s17 = sphi %s1126_s17, %s1451_s17   ;;  %s1069_s16 = sphi %s1124_s16, %s1450_s16   ;;  %s1065_s15 = sphi %s1122_s15, %s1449_s15   ;;  %s1061_s14 = sphi %s1120_s14, %s1448_s14   ;;  %s1057_s13 = sphi %s1118_s13, %s1447_s13   ;;  %s1053_s12 = sphi %s1116_s12, %s1446_s12  }
   0x7   : > { %p26_p0 = scmp.ge.s32.totalorder %s25_s23, 2  ;;  %s28_s24 = sadd.s32 1, %s1085_s20 }
   0x8   : > { %s82_s25 = sadd.s32 1, %s1069_s16  ;;  %p89_p1 = scmp.ne.s32.totalorder %s1069_s16, %s1065_s15 }
   0x9   : > { %s1456_s23 = smov (%p26_p0, %s25_s23), 0  ;;  %s1458_s24 = smov (!%p26_p0, %s28_s24), %s1085_s20 }
   0xa   : > { %p90_p2 = scmp.eq.s32.totalorder %s1089_s21, 0  ;;  %p95_p3 = scmp.ne.s32.totalorder %s1065_s15, %s1061_s14 }
   0xb   : > { %p30_p4 = scmp.ge.s32.totalorder %s1458_s24, 2  ;;  %p96_p5 = scmp.eq.s32.totalorder %s732_s22, 0 }
   0xc   : > { %p1175_p6 = por %p90_p2, %p89_p1  ;;  %s105_s27 = ssub.s32 %s1081_s19, %s1456_s23 }
   0xd   : > { %s1460_s24 = smov (%p30_p4, %s1458_s24), 0  ;;  %p1183_p7 = por %p96_p5, %p95_p3 }
   0xe   : > { %1440 = sst [smem:[#allocation6_spill]] %s1460_s24  ;;  %s110_s29 = sadd.s32 1, %s1057_s13 }
   0xf   : > { %s79_s30 = ssub.s32 %s1085_s20, %s1460_s24  ;;  %p120_p8 = scmp.ne.s32.totalorder %s1057_s13, %s1053_s12 }
  0x10   : > { %p80_p9 = scmp.eq.s32.totalorder %s79_s30, 0  ;;  %s107_s4 = sor.u32 %s105_s27, %s79_s30 }
  0x11   : > { %p108_p10 = scmp.eq.s32.totalorder %s107_s4, 0  ;;  %p121_p11 = scmp.eq.s32.totalorder %s732_s22, 3 }
  0x12   : > { %s1193_s5 = scalar_select %p80_p9, %s1069_s16, %s82_s25  }
  0x13   : > { %s1196_s6 = scalar_select %p108_p10, %s1057_s13, %s110_s29  }
  0x14   : > { %p1198_p12 = por %p121_p11, %p120_p8  ;;  %p892_p13 = scmp.lt.s32.totalorder %s1089_s21, 4 }
  0x15   : > { %s158_s8 = sand.u32 1, %s1069_s16   ;;  %s752_s10 = sshll.u32 %s1085_s20, 9 }
  0x16   : > { %s1442_s7 = scalar_select %p1198_p12, 1, 0 }
  0x17   : > { %s736_s9 = sshll.u32 %s158_s8, 10  ;;  %s1208_s24 = scalar_lea.hbm %s1436_s2, %s752_s10 }
  0x18   : > { %s162_s22 = scalar_lea.vmem [#allocation2], %s736_s9  ;;  %p1214_p0 = pnand %p892_p13, %p1175_p6 }
  0x19   : > { %s169_s25 = sshll.u32 %s162_s22, 4  ;;  %s1218_s29 = scalar_lea.sflag [#allocation3], %s158_s8  ;;  %s1210_s25 = int_to_ptr.vmem [resolvable:$true] %s169_s25 }
  0x1a   : > { %s977_s30 = scalar_lea.hbm %s1208_s24, 16384  ;;  %p979_p2 = pneg %p1214_p0 }
  0x1b   : > { %p978_p1 = scmp.ne.s32.totalorder %s1208_s24, %s977_s30  ;;  %s982_s26 = scalar_lea.hbm %s1436_s2, 32768 }
  0x1c   : > { %p983_p5 = scmp.lt.u32.totalorder %s1208_s24, %s1436_s2  ;;  %p984_p6 = scmp.lt.u32.totalorder %s982_s26, %s977_s30 }
  0x1d   : > { %p980_p3 = pnand %p979_p2, %p978_p1  ;;  %p986_p9 = scmp.lt.u32.totalorder %s977_s30, %s1208_s24 }
  0x1e   : > { %p985_p8 = por %p984_p6, %p983_p5 }
  0x1f   : > { %p981_p4 = pneg %p980_p3 }
  0x20   : > { %p987_p10 = por %p986_p9, %p985_p8 }
  0x22   : > { %p988_p11 = pnand %p987_p10, %p981_p4 }
  0x24   : > { %991 = shalt.err (!%p988_p11)
}
  0x25   : > { %s992_s8 = scalar_lea.vmem %s1210_s25, 16384  ;;  %s1091_s14 = smov [#allocation2]  }
  0x26   : > { %p993_p13 = scmp.ne.s32.totalorder %s1210_s25, %s992_s8  ;;  %s997_s22 = sshll.u32 %s1091_s14, 4  ;;  %s998_s22 = int_to_ptr.vmem [resolvable:$false] %s997_s22 }
  0x27   : > { %s999_s4 = scalar_lea.vmem %s998_s22, 32768  ;;  %p1000_p12 = scmp.lt.s32.totalorder %s1210_s25, %s998_s22 }
  0x28   : > { %p995_p1 = pnand %p993_p13, %p979_p2  ;;  %p1001_p5 = scmp.lt.s32.totalorder %s999_s4, %s992_s8 }
  0x2a   : > { %p996_p3 = pneg %p995_p1  ;;  %p1002_p6 = por %p1001_p5, %p1000_p12 }
  0x2c   : > { %p1003_p8 = pnand %p1002_p6, %p996_p3 }
  0x2e   : > { %1006 = shalt.err (!%p1003_p8)
}
  0x2f   : > { %s1092_s30 = smov 1024   ;;  %s1093_s9 = smov 512  }
  0x30   : > { %s1094_s26 = smov 32   ;;  %p739_p2 = scmp.ge.s32.totalorder %s1089_s21, 1 }
  0x31   : > { %891 = dma.hbm_to_vmem [thread:$0]  (!%p1214_p0), %s1208_s24, 16384, %s1210_s25, %s1218_s29, %s1092_s30, %s1093_s9, %s1094_s26  }
  0x32   : > { %p177_p4 = scmp.lt.s32.totalorder %s1089_s21, 5 }
  0x34   : > { %p178_p9 = pnand %p739_p2, %p177_p4 }
  0x35   : > { %s183_s10 = sand.u32 (!%p178_p9), 1, %s1065_s15  }
  0x36   : > { %181 = sbr.rel (%p178_p9) target bundleno = 515 (0x203), region = 32  ;;  %s740_s11 = sshll.u32 (!%p178_p9), %s183_s10, 10 }
  0x37   : > { %s184_s8 = scalar_lea.sflag (!%p178_p9), [#allocation3], %s183_s10  ;;  %s1249_s14 = scalar_lea.vmem (!%p178_p9), [#allocation2], %s740_s11 }
  0x3d   : > { %1048 = dma.done.wait (%p1183_p7), %s184_s8, 16384  }
  0x3e   : > { %1050 = vsyncadd (%p1183_p7), %s184_s8, 4294950912  ;;  %p214_p12 = scmp.lt.s32.totalorder %s1073_s17, 1  ;;  %v1095_v0 = vmov 0.0   ;;  %v221_v7 = vld [vmem:[%s1435_s1] sm:$0xff]  ;;  %v312_v8 = vld [vmem:[%s1249_s14 + $0x8] sm:$0xff]  ;;  %vm227_vm0 = vcmask 130048  }
  0x3f   : > { %298 = vmatprep.mubr.f32.mxu0 %v1095_v0  ;;  %v316_v9 = vld [vmem:[%s1249_s14 + $0x28] sm:$0xff]  ;;  %v314_v10 = vld [vmem:[%s1249_s14 + $0x18] sm:$0xff]  ;;  %v311_v13 = vld [vmem:[%s1249_s14] sm:$0xff]  ;;  %s211_s26 = sand.u32 1, %s1053_s12   ;;  %p1444_p7 = scmp.ne.s32.totalorder %s1442_s7, 0 }
  0x40   : > { %s215_s24 = scalar_select %p214_p12, %s1073_s17, 1  ;;  %v758_v11 = vpack.c.bf16 %v316_v9, %v312_v8  ;;  %v318_v12 = vld [vmem:[%s1249_s14 + $0x38] sm:$0xff]  ;;  %v315_v14 = vld [vmem:[%s1249_s14 + $0x20] sm:$0xff]  ;;  %v313_v17 = vld [vmem:[%s1249_s14 + $0x10] sm:$0xff] }
  0x41   : > { %v822_v15 = vpack.c.bf16 %v318_v12, %v314_v10  ;;  %v760_v16 = vpack.c.bf16 %v315_v14, %v311_v13  ;;  %v317_v18 = vld [vmem:[%s1249_s14 + $0x30] sm:$0xff]  ;;  %v320_v19 = vld [vmem:[%s1249_s14 + $0x48] sm:$0xff]  ;;  %v322_v22 = vld [vmem:[%s1249_s14 + $0x58] sm:$0xff]  ;;  %s741_s10 = sshll.u32 %s211_s26, 6  ;;  %s747_s12 = sshll.u32 (%p1444_p7), %s1077_s18, 2 }
  0x42   : > { %s753_s25 = sshll.u32 %s215_s24, 5  ;;  %759 = vmatprep.subr.bf16.mxu1 %v758_v11  ;;  %v824_v20 = vpack.c.bf16 %v317_v18, %v313_v17  ;;  %v324_v21 = vld [vmem:[%s1249_s14 + $0x68] sm:$0xff]  ;;  %v326_v23 = vld [vmem:[%s1249_s14 + $0x78] sm:$0xff]  ;;  %v319_v27 = vld [vmem:[%s1249_s14 + $0x40] sm:$0xff]  ;;  %s213_s11 = scalar_lea.vmem [#allocation4], %s741_s10 }
  0x43   : > { %s218_s22 = scalar_lea.vmem %s1434_s0, %s753_s25  ;;  %v222_v24 = vld [vmem:[%s1435_s1 + $0x8] sm:$0xff]  ;;  %761 = vmatpush1.bf16.msra.mxu1 %v760_v16  ;;  %v762_v25 = vpack.c.bf16 %v324_v21, %v320_v19  ;;  %v826_v26 = vpack.c.bf16 %v326_v23, %v322_v22  ;;  %v323_v28 = vld [vmem:[%s1249_s14 + $0x60] sm:$0xff]  ;;  %v321_v29 = vld [vmem:[%s1249_s14 + $0x50] sm:$0xff]  ;;  %s748_s8 = sshll.u32 (%p1444_p7), %s1073_s17, 4 }
  0x44   : > { %v224_v1 = vld [vmem:[%s218_s22 + $0x8] sm:$0xff]  ;;  %v226_v2 = vld [vmem:[%s218_s22 + $0x18] sm:$0xff]  ;;  %v223_v3 = vld [vmem:[%s218_s22] sm:$0xff]  ;;  %v764_v30 = vpack.c.bf16 %v323_v28, %v319_v27 }
  0x45   : > { %v754_v4 = vpack.c.bf16 %v226_v2, %v224_v1  ;;  %v225_v5 = vld [vmem:[%s218_s22 + $0x10] sm:$0xff]  ;;  %v328_v32 = vld [vmem:[%s1249_s14 + $0x88] sm:$0xff]  ;;  %v330_v36 = vld [vmem:[%s1249_s14 + $0x98] sm:$0xff]  ;;  %763 = vmatprep.subr.bf16.mxu1 %v762_v25 }
  0x46   : > { %v756_v6 = vpack.c.bf16 %v225_v5, %v223_v3  ;;  %v325_v31 = vld [vmem:[%s1249_s14 + $0x70] sm:$0xff]  ;;  %v332_v33 = vld [vmem:[%s1249_s14 + $0xa8] sm:$0xff]  ;;  %v334_v37 = vld [vmem:[%s1249_s14 + $0xb8] sm:$0xff] }
  0x47   : > { %755 = vmatprep.subr.bf16.mxu0 %v754_v4  ;;  %v828_v34 = vpack.c.bf16 %v325_v31, %v321_v29  ;;  %v766_v35 = vpack.c.bf16 %v332_v33, %v328_v32  ;;  %v327_v38 = vld [vmem:[%s1249_s14 + $0x80] sm:$0xff]  ;;  %v830_v39 = vpack.c.bf16 %v334_v37, %v330_v36  ;;  %v329_v41 = vld [vmem:[%s1249_s14 + $0x90] sm:$0xff]  ;;  %765 = vmatpush1.bf16.msra.mxu1 %v764_v30  ;;  %v336_v44 = vld [vmem:[%s1249_s14 + $0xc8] sm:$0xff] }
  0x48   : > { %757 = vmatpush1.bf16.msra.mxu0 %v756_v6  ;;  %v331_v40 = vld [vmem:[%s1249_s14 + $0xa0] sm:$0xff]  ;;  %v333_v42 = vld [vmem:[%s1249_s14 + $0xb0] sm:$0xff]  ;;  %v340_v45 = vld [vmem:[%s1249_s14 + $0xe8] sm:$0xff] }
  0x49   : > { %823 = vmatprep.subr.bf16.mxu0 %v822_v15  ;;  %v768_v43 = vpack.c.bf16 %v331_v40, %v327_v38  ;;  %v338_v46 = vld [vmem:[%s1249_s14 + $0xd8] sm:$0xff]  ;;  %767 = vmatprep.subr.bf16.mxu1 %v766_v35  ;;  %v770_v47 = vpack.c.bf16 %v340_v45, %v336_v44  ;;  %v335_v49 = vld [vmem:[%s1249_s14 + $0xc0] sm:$0xff]  ;;  %v832_v51 = vpack.c.bf16 %v333_v42, %v329_v41  ;;  %v344_v52 = vld [vmem:[%s1249_s14 + $0x108] sm:$0xff] }
  0x4a   : > { %v342_v48 = vld [vmem:[%s1249_s14 + $0xf8] sm:$0xff]  ;;  %v339_v50 = vld [vmem:[%s1249_s14 + $0xe0] sm:$0xff]  ;;  %v337_v54 = vld [vmem:[%s1249_s14 + $0xd0] sm:$0xff] }
  0x4b   : > { %744 = vmatmul.mubr.msk.f32.vlgmr.msra.gmra.mrb[0].mxu0 %vm227_vm0, %v221_v7  ;;  %v834_v53 = vpack.c.bf16 %v342_v48, %v338_v46  ;;  %v341_v55 = vld [vmem:[%s1249_s14 + $0xf0] sm:$0xff]  ;;  %v348_v56 = vld [vmem:[%s1249_s14 + $0x128] sm:$0xff]  ;;  %769 = vmatpush1.bf16.msra.mxu1 %v768_v43  ;;  %v772_v57 = vpack.c.bf16 %v339_v50, %v335_v49  ;;  %v346_v58 = vld [vmem:[%s1249_s14 + $0x118] sm:$0xff] }
  0x4c   : > { %304 = vmatprep.mubr.f32.mxu0 %v1095_v0  ;;  %825 = vmatpush1.bf16.msra.mxu0 %v824_v20  ;;  %v350_v59 = vld [vmem:[%s1249_s14 + $0x138] sm:$0xff]  ;;  %v774_v60 = vpack.c.bf16 %v348_v56, %v344_v52  ;;  %v343_v61 = vld [vmem:[%s1249_s14 + $0x100] sm:$0xff]  ;;  %v836_v63 = vpack.c.bf16 %v341_v55, %v337_v54  ;;  %v352_v0 = vld [vmem:[%s1249_s14 + $0x148] sm:$0xff] }
  0x4d   : > { %827 = vmatprep.subr.bf16.mxu0 %v826_v26  ;;  %771 = vmatprep.subr.bf16.mxu1 %v770_v47  ;;  %v347_v62 = vld [vmem:[%s1249_s14 + $0x120] sm:$0xff]  ;;  %v356_v1 = vld [vmem:[%s1249_s14 + $0x168] sm:$0xff]  ;;  %v838_v2 = vpack.c.bf16 %v350_v59, %v346_v58  ;;  %v345_v3 = vld [vmem:[%s1249_s14 + $0x110] sm:$0xff] }
  0x4e   : > { %v349_v4 = vld [vmem:[%s1249_s14 + $0x130] sm:$0xff]  ;;  %v776_v5 = vpack.c.bf16 %v347_v62, %v343_v61  ;;  %v354_v6 = vld [vmem:[%s1249_s14 + $0x158] sm:$0xff]  ;;  %v778_v8 = vpack.c.bf16 %v356_v1, %v352_v0  ;;  %v351_v9 = vld [vmem:[%s1249_s14 + $0x140] sm:$0xff] }
  0x4f   : > { %745 = vmatmul.mubr.msk.f32.gmra.mrb[2].mxu0 %vm227_vm0, %v222_v24  ;;  %773 = vmatpush1.bf16.msra.mxu1 %v772_v57  ;;  %v358_v7 = vld [vmem:[%s1249_s14 + $0x178] sm:$0xff]  ;;  %v355_v10 = vld [vmem:[%s1249_s14 + $0x160] sm:$0xff]  ;;  %v840_v11 = vpack.c.bf16 %v349_v4, %v345_v3  ;;  %v360_v12 = vld [vmem:[%s1249_s14 + $0x188] sm:$0xff] }
  0x50   : > { %829 = vmatpush1.bf16.msra.mxu0 %v828_v34  ;;  %775 = vmatprep.subr.bf16.mxu1 %v774_v60  ;;  %v364_v13 = vld [vmem:[%s1249_s14 + $0x1a8] sm:$0xff]  ;;  %v842_v14 = vpack.c.bf16 %v358_v7, %v354_v6  ;;  %v353_v15 = vld [vmem:[%s1249_s14 + $0x150] sm:$0xff]  ;;  %v780_v17 = vpack.c.bf16 %v355_v10, %v351_v9  ;;  %v362_v18 = vld [vmem:[%s1249_s14 + $0x198] sm:$0xff] }
  0x51   : > { %831 = vmatprep.subr.bf16.mxu0 %v830_v39  ;;  %v357_v16 = vld [vmem:[%s1249_s14 + $0x170] sm:$0xff]  ;;  %v366_v19 = vld [vmem:[%s1249_s14 + $0x1b8] sm:$0xff]  ;;  %v782_v20 = vpack.c.bf16 %v364_v13, %v360_v12  ;;  %v359_v21 = vld [vmem:[%s1249_s14 + $0x180] sm:$0xff] }
  0x52   : > { %v363_v22 = vld [vmem:[%s1249_s14 + $0x1a0] sm:$0xff]  ;;  %v844_v23 = vpack.c.bf16 %v357_v16, %v353_v15  ;;  %v368_v24 = vld [vmem:[%s1249_s14 + $0x1c8] sm:$0xff]  ;;  %v846_v26 = vpack.c.bf16 %v366_v19, %v362_v18  ;;  %v361_v27 = vld [vmem:[%s1249_s14 + $0x190] sm:$0xff] }
  0x53   : > { %777 = vmatpush1.bf16.msra.mxu1 %v776_v5  ;;  %v372_v25 = vld [vmem:[%s1249_s14 + $0x1e8] sm:$0xff]  ;;  %v365_v28 = vld [vmem:[%s1249_s14 + $0x1b0] sm:$0xff]  ;;  %v784_v29 = vpack.c.bf16 %v363_v22, %v359_v21  ;;  %v370_v30 = vld [vmem:[%s1249_s14 + $0x1d8] sm:$0xff] }
  0x54   : > { %833 = vmatpush1.bf16.msra.mxu0 %v832_v51  ;;  %779 = vmatprep.subr.bf16.mxu1 %v778_v8  ;;  %v374_v31 = vld [vmem:[%s1249_s14 + $0x1f8] sm:$0xff]  ;;  %v786_v32 = vpack.c.bf16 %v372_v25, %v368_v24  ;;  %v367_v33 = vld [vmem:[%s1249_s14 + $0x1c0] sm:$0xff]  ;;  %v848_v35 = vpack.c.bf16 %v365_v28, %v361_v27  ;;  %v376_v36 = vld [vmem:[%s1249_s14 + $0x208] sm:$0xff] }
  0x55   : > { %835 = vmatprep.subr.bf16.mxu0 %v834_v53  ;;  %v371_v34 = vld [vmem:[%s1249_s14 + $0x1e0] sm:$0xff]  ;;  %v380_v37 = vld [vmem:[%s1249_s14 + $0x228] sm:$0xff]  ;;  %v850_v38 = vpack.c.bf16 %v374_v31, %v370_v30  ;;  %v369_v39 = vld [vmem:[%s1249_s14 + $0x1d0] sm:$0xff] }
  0x56   : > { %v373_v40 = vld [vmem:[%s1249_s14 + $0x1f0] sm:$0xff]  ;;  %v788_v41 = vpack.c.bf16 %v371_v34, %v367_v33  ;;  %v378_v42 = vld [vmem:[%s1249_s14 + $0x218] sm:$0xff]  ;;  %v790_v44 = vpack.c.bf16 %v380_v37, %v376_v36  ;;  %v375_v45 = vld [vmem:[%s1249_s14 + $0x200] sm:$0xff] }
  0x57   : > { %781 = vmatpush1.bf16.msra.mxu1 %v780_v17  ;;  %v382_v43 = vld [vmem:[%s1249_s14 + $0x238] sm:$0xff]  ;;  %v379_v46 = vld [vmem:[%s1249_s14 + $0x220] sm:$0xff]  ;;  %v852_v47 = vpack.c.bf16 %v373_v40, %v369_v39  ;;  %v384_v48 = vld [vmem:[%s1249_s14 + $0x248] sm:$0xff] }
  0x58   : > { %837 = vmatpush1.bf16.msra.mxu0 %v836_v63  ;;  %783 = vmatprep.subr.bf16.mxu1 %v782_v20  ;;  %v388_v49 = vld [vmem:[%s1249_s14 + $0x268] sm:$0xff]  ;;  %v854_v50 = vpack.c.bf16 %v382_v43, %v378_v42  ;;  %v377_v51 = vld [vmem:[%s1249_s14 + $0x210] sm:$0xff]  ;;  %v792_v53 = vpack.c.bf16 %v379_v46, %v375_v45  ;;  %v386_v54 = vld [vmem:[%s1249_s14 + $0x258] sm:$0xff] }
  0x59   : > { %839 = vmatprep.subr.bf16.mxu0 %v838_v2  ;;  %v381_v52 = vld [vmem:[%s1249_s14 + $0x230] sm:$0xff]  ;;  %v390_v55 = vld [vmem:[%s1249_s14 + $0x278] sm:$0xff]  ;;  %v794_v56 = vpack.c.bf16 %v388_v49, %v384_v48  ;;  %v383_v57 = vld [vmem:[%s1249_s14 + $0x240] sm:$0xff] }
  0x5a   : > { %v387_v58 = vld [vmem:[%s1249_s14 + $0x260] sm:$0xff]  ;;  %v856_v59 = vpack.c.bf16 %v381_v52, %v377_v51  ;;  %v392_v60 = vld [vmem:[%s1249_s14 + $0x288] sm:$0xff]  ;;  %v858_v62 = vpack.c.bf16 %v390_v55, %v386_v54  ;;  %v385_v63 = vld [vmem:[%s1249_s14 + $0x250] sm:$0xff] }
  0x5b   : > { %785 = vmatpush1.bf16.msra.mxu1 %v784_v29  ;;  %v396_v61 = vld [vmem:[%s1249_s14 + $0x2a8] sm:$0xff]  ;;  %v389_v0 = vld [vmem:[%s1249_s14 + $0x270] sm:$0xff]  ;;  %v796_v1 = vpack.c.bf16 %v387_v58, %v383_v57  ;;  %v394_v2 = vld [vmem:[%s1249_s14 + $0x298] sm:$0xff] }
  0x5c   : > { %841 = vmatpush1.bf16.msra.mxu0 %v840_v11  ;;  %787 = vmatprep.subr.bf16.mxu1 %v786_v32  ;;  %v398_v3 = vld [vmem:[%s1249_s14 + $0x2b8] sm:$0xff]  ;;  %v798_v4 = vpack.c.bf16 %v396_v61, %v392_v60  ;;  %v391_v5 = vld [vmem:[%s1249_s14 + $0x280] sm:$0xff]  ;;  %v860_v7 = vpack.c.bf16 %v389_v0, %v385_v63  ;;  %v400_v8 = vld [vmem:[%s1249_s14 + $0x2c8] sm:$0xff] }
  0x5d   : > { %843 = vmatprep.subr.bf16.mxu0 %v842_v14  ;;  %v395_v6 = vld [vmem:[%s1249_s14 + $0x2a0] sm:$0xff]  ;;  %v404_v9 = vld [vmem:[%s1249_s14 + $0x2e8] sm:$0xff]  ;;  %v862_v10 = vpack.c.bf16 %v398_v3, %v394_v2  ;;  %v393_v11 = vld [vmem:[%s1249_s14 + $0x290] sm:$0xff] }
  0x5e   : > { %v397_v12 = vld [vmem:[%s1249_s14 + $0x2b0] sm:$0xff]  ;;  %v800_v13 = vpack.c.bf16 %v395_v6, %v391_v5  ;;  %v402_v14 = vld [vmem:[%s1249_s14 + $0x2d8] sm:$0xff]  ;;  %v802_v16 = vpack.c.bf16 %v404_v9, %v400_v8  ;;  %v399_v17 = vld [vmem:[%s1249_s14 + $0x2c0] sm:$0xff] }
  0x5f   : > { %789 = vmatpush1.bf16.msra.mxu1 %v788_v41  ;;  %v406_v15 = vld [vmem:[%s1249_s14 + $0x2f8] sm:$0xff]  ;;  %v403_v18 = vld [vmem:[%s1249_s14 + $0x2e0] sm:$0xff]  ;;  %v864_v19 = vpack.c.bf16 %v397_v12, %v393_v11  ;;  %v408_v20 = vld [vmem:[%s1249_s14 + $0x308] sm:$0xff] }
  0x60   : > { %845 = vmatpush1.bf16.msra.mxu0 %v844_v23  ;;  %791 = vmatprep.subr.bf16.mxu1 %v790_v44  ;;  %v412_v21 = vld [vmem:[%s1249_s14 + $0x328] sm:$0xff]  ;;  %v866_v22 = vpack.c.bf16 %v406_v15, %v402_v14  ;;  %v401_v23 = vld [vmem:[%s1249_s14 + $0x2d0] sm:$0xff]  ;;  %v804_v25 = vpack.c.bf16 %v403_v18, %v399_v17  ;;  %v414_v27 = vld [vmem:[%s1249_s14 + $0x338] sm:$0xff] }
  0x61   : > { %847 = vmatprep.subr.bf16.mxu0 %v846_v26  ;;  %v405_v24 = vld [vmem:[%s1249_s14 + $0x2f0] sm:$0xff]  ;;  %v410_v26 = vld [vmem:[%s1249_s14 + $0x318] sm:$0xff]  ;;  %v806_v28 = vpack.c.bf16 %v412_v21, %v408_v20  ;;  %v407_v29 = vld [vmem:[%s1249_s14 + $0x300] sm:$0xff] }
  0x62   : > { %v411_v30 = vld [vmem:[%s1249_s14 + $0x320] sm:$0xff]  ;;  %v868_v31 = vpack.c.bf16 %v405_v24, %v401_v23  ;;  %v416_v32 = vld [vmem:[%s1249_s14 + $0x348] sm:$0xff]  ;;  %v870_v34 = vpack.c.bf16 %v414_v27, %v410_v26  ;;  %v413_v36 = vld [vmem:[%s1249_s14 + $0x330] sm:$0xff] }
  0x63   : > { %793 = vmatpush1.bf16.msra.mxu1 %v792_v53  ;;  %v420_v33 = vld [vmem:[%s1249_s14 + $0x368] sm:$0xff]  ;;  %v808_v37 = vpack.c.bf16 %v411_v30, %v407_v29  ;;  %v422_v39 = vld [vmem:[%s1249_s14 + $0x378] sm:$0xff]  ;;  %v415_v41 = vld [vmem:[%s1249_s14 + $0x340] sm:$0xff] }
  0x64   : > { %849 = vmatpush1.bf16.msra.mxu0 %v848_v35  ;;  %795 = vmatprep.subr.bf16.mxu1 %v794_v56  ;;  %v409_v35 = vld [vmem:[%s1249_s14 + $0x310] sm:$0xff]  ;;  %v810_v40 = vpack.c.bf16 %v420_v33, %v416_v32  ;;  %v419_v42 = vld [vmem:[%s1249_s14 + $0x360] sm:$0xff]  ;;  %v424_v44 = vld [vmem:[%s1249_s14 + $0x388] sm:$0xff] }
  0x65   : > { %851 = vmatprep.subr.bf16.mxu0 %v850_v38  ;;  %v418_v38 = vld [vmem:[%s1249_s14 + $0x358] sm:$0xff]  ;;  %v872_v43 = vpack.c.bf16 %v413_v36, %v409_v35  ;;  %v428_v45 = vld [vmem:[%s1249_s14 + $0x3a8] sm:$0xff]  ;;  %v421_v48 = vld [vmem:[%s1249_s14 + $0x370] sm:$0xff]  ;;  %v812_v49 = vpack.c.bf16 %v419_v42, %v415_v41 }
  0x66   : > { %v874_v46 = vpack.c.bf16 %v422_v39, %v418_v38  ;;  %v430_v51 = vld [vmem:[%s1249_s14 + $0x3b8] sm:$0xff]  ;;  %v814_v52 = vpack.c.bf16 %v428_v45, %v424_v44  ;;  %v423_v53 = vld [vmem:[%s1249_s14 + $0x380] sm:$0xff]  ;;  %v432_v56 = vld [vmem:[%s1249_s14 + $0x3c8] sm:$0xff] }
  0x67   : > { %797 = vmatpush1.bf16.msra.mxu1 %v796_v1  ;;  %v427_v54 = vld [vmem:[%s1249_s14 + $0x3a0] sm:$0xff]  ;;  %v436_v57 = vld [vmem:[%s1249_s14 + $0x3e8] sm:$0xff]  ;;  %v429_v60 = vld [vmem:[%s1249_s14 + $0x3b0] sm:$0xff] }
  0x68   : > { %853 = vmatpush1.bf16.msra.mxu0 %v852_v47  ;;  %799 = vmatprep.subr.bf16.mxu1 %v798_v4  ;;  %v417_v47 = vld [vmem:[%s1249_s14 + $0x350] sm:$0xff]  ;;  %v816_v61 = vpack.c.bf16 %v427_v54, %v423_v53  ;;  %v438_v63 = vld [vmem:[%s1249_s14 + $0x3f8] sm:$0xff]  ;;  %v818_v0 = vpack.c.bf16 %v436_v57, %v432_v56  ;;  %v431_v3 = vld [vmem:[%s1249_s14 + $0x3c0] sm:$0xff] }
  0x69   : > { %855 = vmatprep.subr.bf16.mxu0 %v854_v50  ;;  %v426_v50 = vld [vmem:[%s1249_s14 + $0x398] sm:$0xff]  ;;  %v876_v55 = vpack.c.bf16 %v421_v48, %v417_v47  ;;  %v435_v4 = vld [vmem:[%s1249_s14 + $0x3e0] sm:$0xff]  ;;  %v433_v5 = vld [vmem:[%s1249_s14 + $0x3d0] sm:$0xff] }
  0x6a   : > { %v878_v58 = vpack.c.bf16 %v430_v51, %v426_v50  ;;  %v820_v6 = vpack.c.bf16 %v435_v4, %v431_v3 }
  0x6b   : > { %801 = vmatpush1.bf16.msra.mxu1 %v800_v13 }
  0x6c   : > { %857 = vmatpush1.bf16.msra.mxu0 %v856_v59  ;;  %803 = vmatprep.subr.bf16.mxu1 %v802_v16  ;;  %v425_v59 = vld [vmem:[%s1249_s14 + $0x390] sm:$0xff] }
  0x6d   : > { %859 = vmatprep.subr.bf16.mxu0 %v858_v62  ;;  %v434_v62 = vld [vmem:[%s1249_s14 + $0x3d8] sm:$0xff]  ;;  %v880_v1 = vpack.c.bf16 %v429_v60, %v425_v59 }
  0x6e   : > { %v882_v2 = vpack.c.bf16 %v438_v63, %v434_v62 }
  0x6f   : > { %805 = vmatpush1.bf16.msra.mxu1 %v804_v25 }
  0x70   : > { %861 = vmatpush1.bf16.msra.mxu0 %v860_v7  ;;  %807 = vmatprep.subr.bf16.mxu1 %v806_v28  ;;  %v437_v7 = vld [vmem:[%s1249_s14 + $0x3f0] sm:$0xff]  ;;  %s610_s14 = sadd.s32 (%p1444_p7), %s748_s8, %s747_s12 }
  0x71   : > { %863 = vmatprep.subr.bf16.mxu0 %v862_v10  ;;  %v884_v8 = vpack.c.bf16 %v437_v7, %v433_v5  ;;  %s749_s24 = sshll.u32 (%p1444_p7), %s610_s14, 3 }
  0x72   : > { %s612_s29 = scalar_lea.vmem (%p1444_p7), %s1437_s3, %s749_s24 }
  0x73   : > { %809 = vmatpush1.bf16.msra.mxu1 %v808_v37 }
  0x74   : > { %865 = vmatpush1.bf16.msra.mxu0 %v864_v19  ;;  %811 = vmatprep.subr.bf16.mxu1 %v810_v40 }
  0x75   : > { %867 = vmatprep.subr.bf16.mxu0 %v866_v22 }
  0x77   : > { %813 = vmatpush1.bf16.msra.mxu1 %v812_v49 }
  0x78   : > { %869 = vmatpush1.bf16.msra.mxu0 %v868_v31  ;;  %815 = vmatprep.subr.bf16.mxu1 %v814_v52 }
  0x79   : > { %871 = vmatprep.subr.bf16.mxu0 %v870_v34 }
  0x7b   : > { %817 = vmatpush1.bf16.msra.mxu1 %v816_v61 }
  0x7c   : > { %873 = vmatpush1.bf16.msra.mxu0 %v872_v43  ;;  %819 = vmatprep.subr.bf16.mxu1 %v818_v0 }
  0x7d   : > { %875 = vmatprep.subr.bf16.mxu0 %v874_v46 }
  0x7f   : > { %821 = vmatpush1.bf16.msra.mxu1 %v820_v6 }
  0x80   : > { %877 = vmatpush1.bf16.msra.mxu0 %v876_v55 }
  0x81   : > { %879 = vmatprep.subr.bf16.mxu0 %v878_v58 }
  0x84   : > { %881 = vmatpush1.bf16.msra.mxu0 %v880_v1 }
  0x85   : > { %883 = vmatprep.subr.bf16.mxu0 %v882_v2 }
  0x88   : > { %885 = vmatpush1.bf16.msra.mxu0 %v884_v8 }
 0x11e   : > { %v300_v9 = vpop.f32.mrb[0].mxu0 }
 0x11f   : > { %v302_v10 = vpop.f32.mrb[1].mxu0 }
 0x120   : > { %503 = vmatprep.mubr.f32.mxu1 %v302_v10  ;;  %580 = vmatprep.mubr.f32.mxu0 %v302_v10 }
 0x121   : > { %504 = vmatmul.mubr.f32.vlgmr.msra.gmra.mrb[0].mxu1 %v300_v9  ;;  %581 = vmatmul.mubr.f32.vlgmr.msra.gmra.mrb[4].mxu0 %v300_v9 }
 0x122   : > { %v306_v11 = vpop.f32.mrb[2].mxu0 }
 0x123   : > { %v308_v12 = vpop.f32.mrb[3].mxu0 }
 0x124   : > { %509 = vmatprep.mubr.f32.mxu1 %v308_v12  ;;  %586 = vmatprep.mubr.f32.mxu0 %v308_v12 }
 0x125   : > { %510 = vmatmul.mubr.f32.gmra.mrb[2].mxu1 %v306_v11  ;;  %587 = vmatmul.mubr.f32.gmra.mrb[6].mxu0 %v306_v11 }
 0x1f4   : > { %v505_v13 = vpop.f32.mrb[0].mxu1  ;;  %v582_v14 = vpop.f32.mrb[4].mxu0  ;;  %607 = sbr.rel (!%p1444_p7) target bundleno = 515 (0x203), region = 40 }
 0x1f5   : > { %593 = vst [vmem:[%s213_s11] sm:$0xff] %v505_v13  ;;  %595 = vst [vmem:[%s213_s11 + $0x10] sm:$0xff] %v582_v14  ;;  %v507_v15 = vpop.f32.mrb[1].mxu1  ;;  %v584_v16 = vpop.f32.mrb[5].mxu0 }
 0x1f6   : > { %594 = vst [vmem:[%s213_s11 + $0x8] sm:$0xff] %v507_v15  ;;  %596 = vst [vmem:[%s213_s11 + $0x18] sm:$0xff] %v584_v16 }
 0x1f8   : > { %v511_v17 = vpop.f32.mrb[2].mxu1  ;;  %v588_v18 = vpop.f32.mrb[6].mxu0 }
 0x1f9   : > { %597 = vst [vmem:[%s213_s11 + $0x20] sm:$0xff] %v511_v17  ;;  %599 = vst [vmem:[%s213_s11 + $0x30] sm:$0xff] %v588_v18  ;;  %v513_v19 = vpop.f32.mrb[3].mxu1  ;;  %v590_v20 = vpop.f32.mrb[7].mxu0 }
 0x1fa   : > { %598 = vst [vmem:[%s213_s11 + $0x28] sm:$0xff] %v513_v19  ;;  %600 = vst [vmem:[%s213_s11 + $0x38] sm:$0xff] %v590_v20 }
 0x1fc   : > { %v625_v21 = vld [vmem:[%s213_s11] sm:$0xff]  ;;  %v629_v23 = vld [vmem:[%s213_s11 + $0x10] sm:$0xff] }
 0x1fd   : > { %v627_v22 = vld [vmem:[%s213_s11 + $0x8] sm:$0xff]  ;;  %v631_v24 = vld [vmem:[%s213_s11 + $0x18] sm:$0xff]  ;;  %626 = vst [vmem:[%s612_s29] sm:$0xff] %v625_v21  ;;  %630 = vst [vmem:[%s612_s29 + $0x10] sm:$0xff] %v629_v23 }
 0x1fe   : > { %628 = vst [vmem:[%s612_s29 + $0x8] sm:$0xff] %v627_v22  ;;  %632 = vst [vmem:[%s612_s29 + $0x18] sm:$0xff] %v631_v24 }
 0x200   : > { %v633_v25 = vld [vmem:[%s213_s11 + $0x20] sm:$0xff]  ;;  %v637_v27 = vld [vmem:[%s213_s11 + $0x30] sm:$0xff] }
 0x201   : > { %v635_v26 = vld [vmem:[%s213_s11 + $0x28] sm:$0xff]  ;;  %v639_v28 = vld [vmem:[%s213_s11 + $0x38] sm:$0xff]  ;;  %634 = vst [vmem:[%s612_s29 + $0x40] sm:$0xff] %v633_v25  ;;  %638 = vst [vmem:[%s612_s29 + $0x50] sm:$0xff] %v637_v27 }
 0x202   : > { %636 = vst [vmem:[%s612_s29 + $0x48] sm:$0xff] %v635_v26  ;;  %640 = vst [vmem:[%s612_s29 + $0x58] sm:$0xff] %v639_v28 }
 0x203 PF: > { %s16_s21 = sadd.s32 1, %s1089_s21   ;;  %s1445_s7 = sld [smem:[#allocation6_spill]] }
 0x204   : > { %p13_p0 = scmp.ge.s32.totalorder %s16_s21, 6   ;;  %s1446_s12 = smov %s1057_s13 }
 0x205   : > { %s1447_s13 = smov %s1196_s6  ;;  %s1448_s14 = smov %s1065_s15 }
 0x206   : > { %s1449_s15 = smov %s1069_s16  ;;  %s1450_s16 = smov %s1193_s5 }
 0x207   : > { %s1451_s17 = smov %s1081_s19  ;;  %s1452_s18 = smov %s1085_s20 }
 0x208   : > { %s1453_s19 = smov %s1456_s23  ;;  %15 = sbr.rel (!%p13_p0) target bundleno = 6 (0x6), region = 98 }
 0x209   : > { %s1454_s20 = smov %s1445_s7 }
 0x20f   :  { %656 = vsyncpa [#allocation3], 1 }
 0x210   :  { %658 = vsyncpa [#allocation3 + $0x1], 1 }

</bundles_post_ra>
